<compile_context>
chip_gen: v6e
topology: v6e:2x2x1
jax: 0.10.0
libtpu: 0.0.40
codegen_flags: <defaults>
</compile_context>

<pallas_src>
import warnings

import jax
import jax.numpy as jnp
from jax.experimental import pallas as pl
from jax.experimental.pallas import tpu as pltpu

_LANE = 128
_SUBLANE = 8
_CHUNK_ROWS = 64          # rows per in-kernel accumulation step (32 KiB / operand)
_SIMPLE_MAX_ROWS = 512    # blocks this small use the single-shot kernel body
_MAX_BLOCK_ROWS = 8192    # 4 MiB/operand tile; 3 inputs x 2 buffers = 24 MiB (v7x-safe)
_HALF_LOG_2PI = 0.5 * float(jnp.log(2.0 * jnp.pi))


def _simple_kernel(x_ref, mu_ref, isig_ref, out_ref):
    """Single-shot partial sum of ((x - mu) * inv_sigma)^2, reduced to (8, 128)."""
    z = (x_ref[...] - mu_ref[...]) * isig_ref[...]
    out_ref[...] = jnp.sum((z * z).reshape(-1, _SUBLANE, _LANE), axis=0)


def _chunked_kernel(x_ref, mu_ref, isig_ref, out_ref):
    """Same reduction, but streamed in 64-row chunks so z / z^2 never become
    full-block VMEM temporaries; the (8,128) accumulator stays vreg-resident."""
    n_chunks = x_ref.shape[0] // _CHUNK_ROWS

    def body(i, acc):
        r = pl.multiple_of(i * _CHUNK_ROWS, _CHUNK_ROWS)
        sl = pl.ds(r, _CHUNK_ROWS)
        z = (x_ref[sl, :] - mu_ref[sl, :]) * isig_ref[sl, :]
        return acc + jnp.sum((z * z).reshape(-1, _SUBLANE, _LANE), axis=0)

    out_ref[...] = jax.lax.fori_loop(
        0, n_chunks, body, jnp.zeros((_SUBLANE, _LANE), jnp.float32))


def _build_partial_sums_call(num_blocks, block_rows):
    """pallas_call computing (num_blocks*8, 128) partial squared-Mahalanobis sums."""
    kernel = _simple_kernel if block_rows <= _SIMPLE_MAX_ROWS else _chunked_kernel
    n_main = num_blocks * block_rows * _LANE
    tile = pl.BlockSpec((block_rows, _LANE), lambda i: (i, 0))
    vmem_limit = min(48 << 20, 6 * block_rows * _LANE * 4 + (16 << 20))
    return pl.pallas_call(
        kernel,
        out_shape=jax.ShapeDtypeStruct((num_blocks * _SUBLANE, _LANE), jnp.float32),
        grid=(num_blocks,),
        in_specs=[tile, tile, tile],
        out_specs=pl.BlockSpec((_SUBLANE, _LANE), lambda i: (i, 0)),
        compiler_params=pltpu.CompilerParams(
            # "parallel" lets the compiler shard blocks across TensorCores on
            # multi-TC chips; block geometry keeps num_blocks >= 2 when possible.
            dimension_semantics=("parallel",),
            vmem_limit_bytes=vmem_limit,
        ),
        cost_estimate=pl.CostEstimate(
            flops=4 * n_main,
            transcendentals=0,
            bytes_accessed=12 * n_main + num_blocks * _SUBLANE * _LANE * 4,
        ),
    )


class ParameterDistributionPallas:
    """Diagonal-Gaussian concretization of `ParameterDistribution`."""

    def __init__(self, num_params: int, key, block_rows: int = _MAX_BLOCK_ROWS):
        n = int(num_params)
        k_mu, k_rho = jax.random.split(key)
        # Deterministic parameter init (flattened Bayes-by-backprop posterior).
        self.mu = 0.1 * jax.random.normal(k_mu, (n,), dtype=jnp.float32)
        self.rho = -1.0 + 0.05 * jax.random.normal(k_rho, (n,), dtype=jnp.float32)
        self.sigma = jax.nn.softplus(self.rho)
        self.n = n

        # ---- static block geometry (chosen once; no per-call padding) ----
        full_rows = n // _LANE
        br = max(_SUBLANE, min(int(block_rows), _MAX_BLOCK_ROWS))
        br = (br // _SUBLANE) * _SUBLANE
        if full_rows < br:
            # Small n: shrink the block so the Pallas kernel still covers the
            # data, keeping >= 2 blocks when possible so both TensorCores get
            # work on v7x-style chips.
            if full_rows >= 2 * _SUBLANE:
                br = max(_SUBLANE, (full_rows // 2 // _SUBLANE) * _SUBLANE)
            else:
                br = _SUBLANE
        if br > _SIMPLE_MAX_ROWS:
            br = (br // _CHUNK_ROWS) * _CHUNK_ROWS  # chunked kernel needs %64 == 0
        self.block_rows = br
        self.num_blocks = full_rows // br           # 0 => tiny-n pure-JAX fallback
        self.n_main = self.num_blocks * br * _LANE
        self.n_tail = n - self.n_main

        # ---- cached parameter slabs (built once; inv_sigma & log-sigma precomputed) ----
        inv_sigma = 1.0 / self.sigma
        if self.num_blocks > 0:
            self.mu_main = self.mu[: self.n_main].reshape(-1, _LANE)
            self.isig_main = inv_sigma[: self.n_main].reshape(-1, _LANE)
        else:
            self.mu_main = jnp.zeros((0, _LANE), jnp.float32)
            self.isig_main = jnp.zeros((0, _LANE), jnp.float32)
        self.mu_tail = self.mu[self.n_main:]
        self.isig_tail = inv_sigma[self.n_main:]
        # Data-independent constant term, computed once.
        self.const_term = (-n * _HALF_LOG_2PI) - jnp.sum(jnp.log(self.sigma))

        self._loglik_jit = jax.jit(self._make_loglik_fn())

    def _make_loglik_fn(self):
        n, n_main, n_tail = self.n, self.n_main, self.n_tail
        num_blocks, br = self.num_blocks, self.block_rows
        aligned = (n % _LANE == 0)
        call = _build_partial_sums_call(num_blocks, br) if num_blocks > 0 else None

        def loglik(values, mu_main, isig_main, mu_tail, isig_tail, const_term):
            flat = values.reshape(-1).astype(jnp.float32)
            sq = jnp.float32(0.0)
            if num_blocks > 0:
                if aligned:
                    # Pure bitcast: no copy of `values`; grid only touches the
                    # full-block prefix of the (rows, 128) view.
                    v2d = flat.reshape(n // _LANE, _LANE)
                else:
                    # TODO(synk): for ragged n (n % 128 != 0) this prefix slice is
                    # one residual copy of ~n_main values; aligned n is copy-free.
                    v2d = jax.lax.slice(flat, (0,), (n_main,)).reshape(-1, _LANE)
                partials = call(v2d, mu_main, isig_main)
                sq = sq + jnp.sum(partials)
            if n_tail > 0:
                # Ragged tail (< block_rows*128 elems): tiny fused plain-JAX reduce.
                zt = (jax.lax.slice(flat, (n_main,), (n,)) - mu_tail) * isig_tail
                sq = sq + jnp.sum(zt * zt)
            return const_term - 0.5 * sq

        return loglik

    def log_likelihood(self, values):
        return self._loglik_jit(values, self.mu_main, self.isig_main,
                                self.mu_tail, self.isig_tail, self.const_term)

    def sample(self, key):
        eps = jax.random.normal(key, self.mu.shape, dtype=jnp.float32)
        return self.mu + self.sigma * eps

    def __call__(self, values):  # == forward()
        warnings.warn(
            "ParameterDistribution should not be called! Use its explicit methods!"
        )
        return self.log_likelihood(values)


def _reference_loglik(values, mu, sigma):
    z = (values - mu) / sigma
    return jnp.sum(-_HALF_LOG_2PI - jnp.log(sigma) - 0.5 * z * z)


if __name__ == "__main__":
    key = jax.random.PRNGKey(0)
    keys = jax.random.split(key, 8)

    def check(out, ref, rtol=2e-4, atol=1e-2):
        assert jnp.allclose(out, ref, rtol=rtol, atol=atol), (out, ref)

    # Case 1: small aligned n -> copy-free reshape, 2-block grid, forward() warn path.
    n1 = 2048
    dist1 = ParameterDistributionPallas(n1, keys[0])
    vals1 = jax.random.normal(keys[1], (n1,), dtype=jnp.float32)
    out1 = jax.block_until_ready(dist1(vals1))  # forward(): warns + log_likelihood
    check(out1, _reference_loglik(vals1, dist1.mu, dist1.sigma))

    # Case 2: ragged n (not a multiple of 128), tiny blocks -> 4-block grid + JAX tail.
    n2 = 5000
    dist2 = ParameterDistributionPallas(n2, keys[2], block_rows=8)
    vals2 = jax.random.normal(keys[3], (n2,), dtype=jnp.float32)
    out2 = jax.block_until_ready(dist2.log_likelihood(vals2))
    check(out2, _reference_loglik(vals2, dist2.mu, dist2.sigma))

    # Case 3: larger aligned n -> chunked fori_loop kernel body, 2 full blocks.
    n3 = 262144
    dist3 = ParameterDistributionPallas(n3, keys[4], block_rows=1024)
    vals3 = jax.random.normal(keys[5], (n3,), dtype=jnp.float32)
    out3 = jax.block_until_ready(dist3.log_likelihood(vals3))
    check(out3, _reference_loglik(vals3, dist3.mu, dist3.sigma), rtol=5e-4, atol=1e-1)

    # Case 4: aligned n whose row count is not a multiple of block_rows ->
    # Pallas covers the full-block prefix of the un-copied view; row tail in JAX.
    n4 = 2304  # 18 rows of 128
    dist4 = ParameterDistributionPallas(n4, keys[6])
    vals4 = jax.random.normal(keys[7], (n4,), dtype=jnp.float32)
    out4 = jax.block_until_ready(dist4.log_likelihood(vals4))
    check(out4, _reference_loglik(vals4, dist4.mu, dist4.sigma))

    print("KERNEL_OK")
</pallas_src>

<mosaic_0001>
module attributes {stable_mosaic.version = 11 : i64} {
  func.func @_simple_kernel(%arg0: i32, %arg1: memref<8x128xf32, #tpu.memory_space<vmem>>, %arg2: memref<8x128xf32, #tpu.memory_space<vmem>>, %arg3: memref<8x128xf32, #tpu.memory_space<vmem>>, %arg4: memref<8x128xf32, #tpu.memory_space<vmem>>) attributes {dimension_semantics = [#tpu.dimension_semantics<parallel>], iteration_bounds = array<i64: 2>, scalar_prefetch = 0 : i64, scratch_operands = 0 : i64, tpu.core_type = #tpu.core_type<tc>, window_params = [{transform_indices = @transform_0, window_bounds = array<i64: 8, 128>}, {transform_indices = @transform_1, window_bounds = array<i64: 8, 128>}, {transform_indices = @transform_2, window_bounds = array<i64: 8, 128>}, {transform_indices = @transform_3, window_bounds = array<i64: 8, 128>}]} {
    %c0 = arith.constant 0 : index
    %c0_0 = arith.constant 0 : index
    %0 = vector.load %arg1[%c0, %c0_0] : memref<8x128xf32, #tpu.memory_space<vmem>>, vector<8x128xf32>
    %c0_1 = arith.constant 0 : index
    %c0_2 = arith.constant 0 : index
    %1 = vector.load %arg2[%c0_1, %c0_2] : memref<8x128xf32, #tpu.memory_space<vmem>>, vector<8x128xf32>
    %2 = arith.subf %0, %1 : vector<8x128xf32>
    %c0_3 = arith.constant 0 : index
    %c0_4 = arith.constant 0 : index
    %3 = vector.load %arg3[%c0_3, %c0_4] : memref<8x128xf32, #tpu.memory_space<vmem>>, vector<8x128xf32>
    %4 = arith.mulf %2, %3 : vector<8x128xf32>
    %5 = arith.mulf %4, %4 : vector<8x128xf32>
    %6 = vector.shape_cast %5 : vector<8x128xf32> to vector<1x8x128xf32>
    %cst = arith.constant dense<0.000000e+00> : vector<8x128xf32>
    %7 = vector.multi_reduction <add>, %6, %cst [0] : vector<1x8x128xf32> to vector<8x128xf32>
    %c0_5 = arith.constant 0 : index
    %c0_6 = arith.constant 0 : index
    %8 = vector.load %arg4[%c0_5, %c0_6] : memref<8x128xf32, #tpu.memory_space<vmem>>, vector<8x128xf32>
    tpu.vector_store %arg4[%c0_5, %c0_6], %7 {strides = array<i32>} : memref<8x128xf32, #tpu.memory_space<vmem>>, vector<8x128xf32>,
    return
  }
  func.func @transform_0(%arg0: i32) -> (i32, i32) {
    %c0_i32 = arith.constant 0 : i32
    %c0_i32_0 = arith.constant 0 : i32
    return %arg0, %c0_i32 : i32, i32
  }
  func.func @transform_1(%arg0: i32) -> (i32, i32) {
    %c0_i32 = arith.constant 0 : i32
    %c0_i32_0 = arith.constant 0 : i32
    return %arg0, %c0_i32 : i32, i32
  }
  func.func @transform_2(%arg0: i32) -> (i32, i32) {
    %c0_i32 = arith.constant 0 : i32
    %c0_i32_0 = arith.constant 0 : i32
    return %arg0, %c0_i32 : i32, i32
  }
  func.func @transform_3(%arg0: i32) -> (i32, i32) {
    %c0_i32 = arith.constant 0 : i32
    %c0_i32_0 = arith.constant 0 : i32
    return %arg0, %c0_i32 : i32, i32
  }
}

</mosaic_0001>

<bundles_post_ra>
// kernel: loglik.1
= control target key start
LH: loop header
LB: loop body
LE: loop exit
PB: predicated region body
PF: predicated region fallthrough
CT: control target
= control target key end

     0   :  { %8 = vsyncpa [#allocation3], 0  ;;  %s759_s0 = inlined_call_operand.hbm [shape: f32[16,128], index: 0, kind: input, shape index: {}]   ;;  %s760_s1 = inlined_call_operand.hbm [shape: f32[16,128], index: 1, kind: input, shape index: {}]   ;;  %s761_s2 = inlined_call_operand.hbm [shape: f32[16,128], index: 2, kind: input, shape index: {}]   ;;  %s762_s3 = inlined_call_operand.vmem [shape: f32[16,128], index: 3, kind: output, shape index: {}]  }
   0x1   :  { %10 = vsyncpa [#allocation3 + $0x1], 0 }
   0x2   :  { %11 = vsyncpa [#allocation5], 0 }
   0x3   :  { %13 = vsyncpa [#allocation5 + $0x1], 0  ;;  %s585_s12 = smov 0   ;;  %s587_s13 = smov 0  }
   0x4   :  { %s589_s14 = smov 0   ;;  %s591_s15 = smov 0  }
   0x5 LB: > { %s604_s16 = sadd.s32 4294967295, %s560_s15   ;;  %s607_s17 = sadd.s32 1, %s560_s15   ;;  %s560_s15 = sphi %s591_s15, %s775_s15   ;;  %s556_s14 = sphi %s589_s14, %s774_s14   ;;  %s552_s13 = sphi %s587_s13, %s773_s13   ;;  %s548_s12 = sphi %s585_s12, %s772_s12  }
   0x6   : > { %s23_s18 = ssub.s32 %s560_s15, %s607_s17  ;;  %s26_s19 = sadd.s32 1, %s556_s14 }
   0x7   : > { %p24_p0 = scmp.eq.s32.totalorder %s23_s18, 0  ;;  %p33_p1 = scmp.ne.s32.totalorder %s556_s14, %s552_s13 }
   0x8   : > { %p34_p2 = scmp.eq.s32.totalorder %s560_s15, 0  ;;  %p39_p3 = scmp.ne.s32.totalorder %s552_s13, %s548_s12 }
   0x9   : > { %s617_s20 = scalar_select %p24_p0, %s556_s14, %s26_s19  }
   0xa   : > { %p35_p4 = por %p34_p2, %p33_p1  ;;  %p40_p5 = scmp.eq.s32.totalorder %s604_s16, 0 }
   0xb   : > { %p405_p6 = scmp.lt.s32.totalorder %s560_s15, 2  ;;  %s141_s22 = sand.u32 1, %s556_s14  }
   0xc   : > { %p621_p7 = por %p40_p5, %p39_p3  ;;  %s628_s23 = sshll.u32 %s141_s22, 3 }
   0xd   : > { %s631_s24 = sshll.u32 %s560_s15, 7  ;;  %p633_p8 = pnand %p405_p6, %p35_p4 }
   0xe   : > { %s764_s21 = scalar_select %p621_p7, 1, 0 }
   0xf   : > { %s159_s26 = sand.u32 1, %s560_s15   ;;  %s642_s29 = scalar_lea.hbm %s760_s1, %s631_s24 }
  0x10   : > { %s163_s30 = scalar_lea.vmem [#allocation4], %s628_s23  ;;  %s647_s5 = scalar_lea.sflag [#allocation5], %s159_s26 }
  0x11   : > { %s170_s4 = sshll.u32 %s163_s30, 4  ;;  %s438_s6 = scalar_lea.hbm %s642_s29, 128  ;;  %s171_s4 = int_to_ptr.vmem [resolvable:$true] %s170_s4 }
  0x12   : > { %p439_p11 = scmp.ne.s32.totalorder %s642_s29, %s438_s6  ;;  %p653_p12 = pneg %p633_p8 }
  0x13   : > { %s443_s10 = scalar_lea.hbm %s760_s1, 256  ;;  %p444_p1 = scmp.lt.s32.totalorder %s642_s29, %s760_s1 }
  0x14   : > { %p441_p13 = pnand %p653_p12, %p439_p11  ;;  %p445_p2 = scmp.lt.s32.totalorder %s443_s10, %s438_s6 }
  0x16   : > { %p442_p0 = pneg %p441_p13  ;;  %p446_p3 = por %p445_p2, %p444_p1 }
  0x18   : > { %p447_p4 = pnand %p446_p3, %p442_p0 }
  0x1a   : > { %450 = shalt.err (!%p447_p4)
}
  0x1b   : > { %s451_s18 = scalar_lea.vmem %s171_s4, 128  ;;  %s562_s19 = smov [#allocation4]  }
  0x1c   : > { %p452_p5 = scmp.ne.s32.totalorder %s171_s4, %s451_s18  ;;  %s456_s26 = sshll.u32 %s562_s19, 4  ;;  %s457_s26 = int_to_ptr.vmem [resolvable:$false] %s456_s26 }
  0x1d   : > { %s458_s27 = scalar_lea.vmem %s457_s26, 256  ;;  %p459_p11 = scmp.lt.s32.totalorder %s171_s4, %s457_s26 }
  0x1e   : > { %p454_p6 = pnand %p452_p5, %p653_p12  ;;  %p460_p13 = scmp.lt.s32.totalorder %s458_s27, %s451_s18 }
  0x20   : > { %p455_p9 = pneg %p454_p6  ;;  %p461_p10 = por %p460_p13, %p459_p11 }
  0x22   : > { %p462_p7 = pnand %p461_p10, %p455_p9 }
  0x24   : > { %465 = shalt.err (!%p462_p7)
}
  0x25   : > { %401 = dma.hbm_to_vmem [thread:$0]  (!%p633_p8), %s642_s29, 128, %s171_s4, %s647_s5  }
  0x26   : > { %p767_p0 = scmp.lt.s32.totalorder %s560_s15, 3  ;;  %p768_p1 = scmp.ge.s32.totalorder %s560_s15, 1 }
  0x27   : > { %s684_s8 = scalar_lea.hbm %s759_s0, %s631_s24  ;;  %s145_s9 = scalar_lea.vmem [#allocation2], %s628_s23 }
  0x28   : > { %p676_p2 = pnand %p768_p1, %p767_p0  ;;  %s152_s10 = sshll.u32 %s145_s9, 4  ;;  %s153_s10 = int_to_ptr.vmem [resolvable:$true] %s152_s10 }
  0x29   : > { %s691_s29 = scalar_lea.hbm %s761_s2, %s631_s24  ;;  %s142_s15 = scalar_lea.sflag [#allocation3], %s141_s22 }
  0x2a   : > { %s769_s28 = scalar_select %p676_p2, 1, 0 }
  0x2b   : > { %s466_s4 = scalar_lea.hbm %s684_s8, 128  ;;  %s471_s26 = scalar_lea.hbm %s759_s0, 256 }
  0x2c   : > { %p467_p7 = scmp.ne.s32.totalorder %s684_s8, %s466_s4  ;;  %p472_p3 = scmp.lt.s32.totalorder %s684_s8, %s759_s0 }
  0x2d   : > { %p473_p4 = scmp.lt.s32.totalorder %s471_s26, %s466_s4 }
  0x2e   : > { %p469_p9 = pnand %p467_p7, %p653_p12 }
  0x2f   : > { %p474_p5 = por %p473_p4, %p472_p3 }
  0x30   : > { %p470_p10 = pneg %p469_p9 }
  0x32   : > { %p475_p6 = pnand %p474_p5, %p470_p10 }
  0x34   : > { %478 = shalt.err (!%p475_p6)
}
  0x35   : > { %s479_s24 = scalar_lea.vmem %s153_s10, 128  ;;  %s563_s22 = smov [#allocation2]  }
  0x36   : > { %p480_p11 = scmp.ne.s32.totalorder %s153_s10, %s479_s24  ;;  %s484_s6 = sshll.u32 %s563_s22, 4  ;;  %s485_s6 = int_to_ptr.vmem [resolvable:$false] %s484_s6 }
  0x37   : > { %s486_s9 = scalar_lea.vmem %s485_s6, 256  ;;  %p487_p1 = scmp.lt.s32.totalorder %s153_s10, %s485_s6 }
  0x38   : > { %p482_p13 = pnand %p480_p11, %p653_p12  ;;  %p488_p7 = scmp.lt.s32.totalorder %s486_s9, %s479_s24 }
  0x3a   : > { %p483_p0 = pneg %p482_p13  ;;  %p489_p9 = por %p488_p7, %p487_p1 }
  0x3c   : > { %p490_p2 = pnand %p489_p9, %p483_p0 }
  0x3e   : > { %493 = shalt.err (!%p490_p2)
}
  0x3f   : > { %398 = dma.hbm_to_vmem [thread:$0]  (!%p633_p8), %s684_s8, 128, %s153_s10, %s142_s15  }
  0x40   : > { %s181_s11 = scalar_lea.vmem [#allocation6], %s628_s23  ;;  %s494_s4 = scalar_lea.hbm %s691_s29, 128 }
  0x41   : > { %s188_s12 = sshll.u32 %s181_s11, 4  ;;  %p495_p10 = scmp.ne.s32.totalorder %s691_s29, %s494_s4  ;;  %s189_s12 = int_to_ptr.vmem [resolvable:$true] %s188_s12 }
  0x42   : > { %s499_s26 = scalar_lea.hbm %s761_s2, 256  ;;  %p500_p2 = scmp.lt.s32.totalorder %s691_s29, %s761_s2 }
  0x43   : > { %p497_p3 = pnand %p495_p10, %p653_p12  ;;  %p501_p5 = scmp.lt.s32.totalorder %s499_s26, %s494_s4 }
  0x45   : > { %p498_p4 = pneg %p497_p3  ;;  %p502_p6 = por %p501_p5, %p500_p2 }
  0x47   : > { %p503_p11 = pnand %p502_p6, %p498_p4 }
  0x49   : > { %506 = shalt.err (!%p503_p11)
}
  0x4a   : > { %s507_s23 = scalar_lea.vmem %s189_s12, 128  ;;  %s564_s8 = smov [#allocation6]  }
  0x4b   : > { %p508_p13 = scmp.ne.s32.totalorder %s189_s12, %s507_s23  ;;  %s512_s10 = sshll.u32 %s564_s8, 4  ;;  %s513_s10 = int_to_ptr.vmem [resolvable:$false] %s512_s10 }
  0x4c   : > { %s514_s15 = scalar_lea.vmem %s513_s10, 256  ;;  %p515_p7 = scmp.lt.s32.totalorder %s189_s12, %s513_s10 }
  0x4d   : > { %p510_p0 = pnand %p508_p13, %p653_p12  ;;  %p516_p9 = scmp.lt.s32.totalorder %s514_s15, %s507_s23 }
  0x4f   : > { %p511_p1 = pneg %p510_p0  ;;  %p517_p10 = por %p516_p9, %p515_p7 }
  0x51   : > { %p518_p3 = pnand %p517_p10, %p511_p1 }
  0x53   : > { %521 = shalt.err (!%p518_p3)
}
  0x54   : > { %404 = dma.hbm_to_vmem [thread:$0]  (!%p633_p8), %s691_s29, 128, %s189_s12, %s647_s5  }
  0x55   : > { %p770_p4 = scmp.ne.s32.totalorder %s769_s28, 0 }
  0x56   : > { %s199_s7 = sand.u32 (!%p770_p4), 1, %s552_s13   ;;  %p771_p12 = scmp.ne.s32.totalorder (!%p770_p4), %s764_s21, 0 }
  0x57   : > { %197 = sbr.rel (%p770_p4) target bundleno = 104 (0x68), region = 32  ;;  %s383_s24 = sshll.u32 (!%p770_p4), %s199_s7, 3 }
  0x58   : > { %s200_s22 = scalar_lea.sflag (!%p770_p4), [#allocation3], %s199_s7  ;;  %s203_s6 = scalar_lea.vmem (!%p770_p4), [#allocation2], %s383_s24 }
  0x5c   : > { %539 = dma.done.wait (%p771_p12), %s200_s22, 128  }
  0x5d   : > { %541 = vsyncadd (%p771_p12), %s200_s22, 4294967168  ;;  %s208_s25 = sand.u32 1, %s604_s16   ;;  %s212_s11 = scalar_lea.vmem [#allocation4], %s383_s24 }
  0x5e   : > { %s209_s9 = scalar_lea.sflag [#allocation5], %s208_s25 }
  0x5f   : > { %543 = dma.done.wait (%p771_p12), %s209_s9, 256  }
  0x60   : > { %545 = vsyncadd (%p771_p12), %s209_s9, 4294967040  ;;  %p253_p8 = scmp.lt.s32.totalorder %s604_s16, 1  ;;  %v257_v0 = vld [vmem:[%s203_s6] sm:$0xff]  ;;  %v258_v1 = vld [vmem:[%s212_s11] sm:$0xff]  ;;  %s221_s5 = scalar_lea.vmem [#allocation6], %s383_s24 }
  0x61   : > { %v260_v2 = vld [vmem:[%s221_s5] sm:$0xff]  ;;  %v259_v3 = vsub.f32 %v257_v0, %v258_v1 }
  0x62   : > { %s777_s16 = smov (!%p253_p8, %s604_s16), 1 }
  0x63   : > { %s386_s28 = sshll.u32 %s777_s16, 3  ;;  %v261_v4 = vmul.f32 %v260_v2, %v259_v3 }
  0x64   : > { %s256_s4 = scalar_lea.vmem %s762_s3, %s386_s28 }
  0x65   : > { %v262_v5 = vmul.f32 %v261_v4, %v261_v4 }
  0x67   : > { %264 = vst [vmem:[%s256_s4] sm:$0xff] %v262_v5 }
  0x68 PF: > { %p16_p2 = scmp.ge.s32.totalorder %s607_s17, 4   ;;  %s772_s12 = smov %s552_s13 }
  0x69   : > { %s773_s13 = smov %s556_s14  ;;  %s774_s14 = smov %s617_s20 }
  0x6a   : > { %s775_s15 = smov %s607_s17  ;;  %18 = sbr.rel (!%p16_p2) target bundleno = 5 (0x5), region = 96 }
  0x6f   :  { %284 = vsyncpa [#allocation3], 1 }
  0x70   :  { %286 = vsyncpa [#allocation3 + $0x1], 1 }
  0x71   :  { %287 = vsyncpa [#allocation5], 1 }
  0x72   :  { %289 = vsyncpa [#allocation5 + $0x1], 1 }

</bundles_post_ra>
